<compile_context>
chip_gen: v7x
topology: tpu7x:2x2x1
jax: 0.10.0
libtpu: 0.0.40
codegen_flags: <defaults>
</compile_context>

<pallas_src>
import jax
import jax.numpy as jnp
from jax.experimental import pallas as pl
from jax.experimental.pallas import tpu as pltpu

INPUT_SIZE = 1
HIDDEN = 32

# bf16 operands + f32 accumulation = single MXU pass per step (perf review item #2).
# Switch to jnp.float32 for exact torch/f32 numerics (slower, multi-pass MXU).
RECURRENCE_MATMUL_DTYPE = jnp.bfloat16


def rnn_kernel(x_ref, h0_ref, w_ih_ref, w_hh_ref, b_ref, w_out_ref, b_out_ref,
               y_ref, hT_ref):
    """Full-sequence Elman RNN with the Linear(32->1) head fused per step.

    x_ref    : (B, T)  batch_first inputs (input_size == 1, singleton dropped)
    h0_ref   : (B, H)  initial hidden state (f32)
    w_ih_ref : (1, H)  input->hidden weight (row form; input_size == 1), f32
    w_hh_ref : (H, H)  hidden->hidden weight, pre-transposed (h @ W), bf16
    b_ref    : (1, H)  b_ih + b_hh, f32
    w_out_ref: (1, H)  output head weight (row form), f32
    b_out_ref: (1,)    output head bias (SMEM scalar)
    y_ref    : (B, T)  per-timestep linear outputs
    hT_ref   : (B, H)  final hidden state
    """
    B, T = x_ref.shape

    # Hoist all loop-invariant reads; everything fits in a handful of vregs.
    w_hh = w_hh_ref[...]           # (H, H)  bf16 -> single-pass MXU RHS
    w_ih = w_ih_ref[...]           # (1, H)
    bias = b_ref[...]              # (1, H)
    w_out = w_out_ref[...]         # (1, H)

    # Vectorized input projection for all timesteps (VPU, off the serial chain):
    #   ih[b, t, h] = x[b, t] * W_ih[h] + (b_ih + b_hh)[h]
    # Packed (B, T, H) layout: (T, H) = (8, 32) trailing tile per batch row, ~2 vregs
    # total -- no (8,128)-padded per-timestep scratch slots.
    ih_all = x_ref[...][:, :, None] * w_ih[None, :, :] + bias[None, :, :]   # (B, T, H)

    # Lane-index map used to scatter each step's head output into its column of the
    # (B, T) accumulator without per-step masked stores to VMEM.
    t_lane = jax.lax.broadcasted_iota(jnp.int32, (B, T), dimension=1)        # (B, T)
    y_acc = jnp.zeros((B, T), jnp.float32)

    # Serial recurrence.  Per-step critical path: bf16 cast -> single-pass MXU matmul
    # -> add -> EUP tanh.  The head reduction and column select below do not feed the
    # next step, so they are free filler under the matmul latency.
    h = h0_ref[...]                                                          # (B, H) f32
    for t in range(T):   # T is small & static; for large T use a T-chunk grid instead.
        hh = jnp.dot(h.astype(RECURRENCE_MATMUL_DTYPE), w_hh,
                     preferred_element_type=jnp.float32)                    # (B, H)
        h = jnp.tanh(ih_all[:, t, :] + hh)                                   # (B, H)
        # Linear(32 -> 1) head, fused per step: cross-lane reduction (XLU).
        y_col = jnp.sum(h * w_out, axis=-1, keepdims=True)                   # (B, 1)
        y_acc = y_acc + jnp.where(t_lane == t, y_col, 0.0)                   # col t

    hT_ref[...] = h
    # Single dense (B, T) store; head bias added once from SMEM.
    y_ref[...] = y_acc + b_out_ref[0]


def rnn_forward(x, h_state, params):
    """x: (B, T, 1) float32, h_state: (1, B, H) float32 (or None -> zeros)."""
    B, T, I = x.shape
    assert I == INPUT_SIZE
    H = HIDDEN
    if h_state is None:
        h_state = jnp.zeros((1, B, H), jnp.float32)

    # batch_first layout goes straight into the kernel: no wrapper transposes.
    x_bt = x[..., 0].astype(jnp.float32)                          # (B, T)
    h0 = h_state[0].astype(jnp.float32)                           # (B, H)
    w_ih_row = params["w_ih"].T.astype(jnp.float32)               # (1, H)
    w_hh_t = params["w_hh"].T.astype(RECURRENCE_MATMUL_DTYPE)     # (H, H) bf16
    b = (params["b_ih"] + params["b_hh"])[None, :].astype(jnp.float32)   # (1, H)
    w_out_row = params["w_out"].astype(jnp.float32)               # (1, H)
    b_out = params["b_out"].astype(jnp.float32)                   # (1,)  -> SMEM

    vmem = pl.BlockSpec(memory_space=pltpu.MemorySpace.VMEM)
    smem = pl.BlockSpec(memory_space=pltpu.MemorySpace.SMEM)

    y_bt, hT = pl.pallas_call(
        rnn_kernel,
        out_shape=(jax.ShapeDtypeStruct((B, T), jnp.float32),
                   jax.ShapeDtypeStruct((B, H), jnp.float32)),
        in_specs=[vmem, vmem, vmem, vmem, vmem, vmem, smem],
        out_specs=(vmem, vmem),
    )(x_bt, h0, w_ih_row, w_hh_t, b, w_out_row, b_out)

    y = y_bt[..., None]            # (B, T, 1)
    return y, hT[None]             # h_state: (1, B, H)


def ref_forward(x, h_state, params):
    """Pure-JAX f32 reference mirroring exact torch semantics."""
    B, T, _ = x.shape
    h = h_state[0]
    outs = []
    for t in range(T):
        h = jnp.tanh(x[:, t, :] @ params["w_ih"].T + params["b_ih"]
                     + h @ params["w_hh"].T + params["b_hh"])
        outs.append(h @ params["w_out"].T + params["b_out"])
    return jnp.stack(outs, axis=1), h[None]


def init_params(key):
    """Deterministic init mimicking torch's U(-1/sqrt(H), 1/sqrt(H))."""
    k = 1.0 / jnp.sqrt(jnp.float32(HIDDEN))
    keys = jax.random.split(key, 6)
    u = lambda kk, shape: jax.random.uniform(kk, shape, jnp.float32, -k, k)
    return {
        "w_ih": u(keys[0], (HIDDEN, INPUT_SIZE)),   # weight_ih_l0
        "w_hh": u(keys[1], (HIDDEN, HIDDEN)),       # weight_hh_l0
        "b_ih": u(keys[2], (HIDDEN,)),              # bias_ih_l0
        "b_hh": u(keys[3], (HIDDEN,)),              # bias_hh_l0
        "w_out": u(keys[4], (1, HIDDEN)),           # out.weight
        "b_out": u(keys[5], (1,)),                  # out.bias
    }


if __name__ == "__main__":
    key = jax.random.PRNGKey(0)
    k_par, k_x, k_h = jax.random.split(key, 3)

    B, T = 2, 8
    params = init_params(k_par)
    x = jax.random.normal(k_x, (B, T, INPUT_SIZE), jnp.float32)
    h_state = jax.random.normal(k_h, (1, B, HIDDEN), jnp.float32)

    y, h_out = rnn_forward(x, h_state, params)
    y = jax.block_until_ready(y)
    h_out = jax.block_until_ready(h_out)

    y_ref, h_ref = ref_forward(x, h_state, params)
    assert y.shape == (B, T, 1) and h_out.shape == (1, B, HIDDEN)
    # The kernel's recurrence matmul uses bf16 operands with f32 accumulation (perf
    # review), so it drifts ~1e-3 from the exact-f32 reference; 5e-2 is a safe bound
    # that still catches any real bug (which would be O(0.1 - 1)).
    assert jnp.allclose(y, y_ref, atol=5e-2, rtol=5e-2)
    assert jnp.allclose(h_out, h_ref, atol=5e-2, rtol=5e-2)

    print("KERNEL_OK")
</pallas_src>

<mosaic_0001>
module attributes {stable_mosaic.version = 11 : i64} {
  func.func @rnn_kernel(%arg0: memref<2x8xf32, #tpu.memory_space<vmem>>, %arg1: memref<2x32xf32, #tpu.memory_space<vmem>>, %arg2: memref<1x32xf32, #tpu.memory_space<vmem>>, %arg3: memref<32x32xbf16, #tpu.memory_space<vmem>>, %arg4: memref<1x32xf32, #tpu.memory_space<vmem>>, %arg5: memref<1x32xf32, #tpu.memory_space<vmem>>, %arg6: memref<1xf32, #tpu.memory_space<smem>>, %arg7: memref<2x8xf32, #tpu.memory_space<vmem>>, %arg8: memref<2x32xf32, #tpu.memory_space<vmem>>) attributes {dimension_semantics = [], scalar_prefetch = 0 : i64, scratch_operands = 0 : i64, tpu.core_type = #tpu.core_type<tc>} {
    %c0 = arith.constant 0 : index
    %c0_0 = arith.constant 0 : index
    %0 = vector.load %arg3[%c0, %c0_0] : memref<32x32xbf16, #tpu.memory_space<vmem>>, vector<32x32xbf16>
    %c0_1 = arith.constant 0 : index
    %c0_2 = arith.constant 0 : index
    %1 = vector.load %arg2[%c0_1, %c0_2] : memref<1x32xf32, #tpu.memory_space<vmem>>, vector<1x32xf32>
    %c0_3 = arith.constant 0 : index
    %c0_4 = arith.constant 0 : index
    %2 = vector.load %arg4[%c0_3, %c0_4] : memref<1x32xf32, #tpu.memory_space<vmem>>, vector<1x32xf32>
    %c0_5 = arith.constant 0 : index
    %c0_6 = arith.constant 0 : index
    %3 = vector.load %arg5[%c0_5, %c0_6] : memref<1x32xf32, #tpu.memory_space<vmem>>, vector<1x32xf32>
    %c0_7 = arith.constant 0 : index
    %c0_8 = arith.constant 0 : index
    %4 = vector.load %arg0[%c0_7, %c0_8] : memref<2x8xf32, #tpu.memory_space<vmem>>, vector<2x8xf32>
    %5 = vector.shape_cast %4 : vector<2x8xf32> to vector<2x8x1xf32>
    %6 = vector.shape_cast %1 : vector<1x32xf32> to vector<1x1x32xf32>
    %7 = vector.broadcast %5 : vector<2x8x1xf32> to vector<2x8x32xf32>
    %8 = vector.broadcast %6 : vector<1x1x32xf32> to vector<2x8x32xf32>
    %9 = arith.mulf %7, %8 : vector<2x8x32xf32>
    %10 = vector.shape_cast %2 : vector<1x32xf32> to vector<1x1x32xf32>
    %11 = vector.broadcast %10 : vector<1x1x32xf32> to vector<2x8x32xf32>
    %12 = arith.addf %9, %11 : vector<2x8x32xf32>
    %13 = tpu.iota {dimensions = array<i32: 1>} : vector<2x8xi32>
    %cst = arith.constant 0.000000e+00 : f32
    %14 = vector.broadcast %cst : f32 to vector<2x8xf32>
    %c0_9 = arith.constant 0 : index
    %c0_10 = arith.constant 0 : index
    %15 = vector.load %arg1[%c0_9, %c0_10] : memref<2x32xf32, #tpu.memory_space<vmem>>, vector<2x32xf32>
    %16 = arith.truncf %15 : vector<2x32xf32> to vector<2x32xbf16>
    %cst_11 = arith.constant dense<0.000000e+00> : vector<2x32xf32>
    %17 = tpu.matmul %16, %0, %cst_11 {dimension_numbers = #tpu.dot_dimension_numbers<[1], [0], [0], [1], [0, 0, 1, 1], [], []>} : vector<2x32xbf16>, vector<32x32xbf16>, vector<2x32xf32> -> vector<2x32xf32>
    %18 = vector.extract_strided_slice %12 {offsets = [0, 0, 0], sizes = [2, 1, 32], strides = [1, 1, 1]} : vector<2x8x32xf32> to vector<2x1x32xf32>
    %19 = vector.shape_cast %18 : vector<2x1x32xf32> to vector<2x32xf32>
    %20 = arith.addf %19, %17 : vector<2x32xf32>
    %21 = math.tanh %20 : vector<2x32xf32>
    %22 = vector.broadcast %3 : vector<1x32xf32> to vector<2x32xf32>
    %23 = arith.mulf %21, %22 : vector<2x32xf32>
    %cst_12 = arith.constant dense<0.000000e+00> : vector<2xf32>
    %24 = vector.multi_reduction <add>, %23, %cst_12 [1] : vector<2x32xf32> to vector<2xf32>
    %25 = vector.shape_cast %24 : vector<2xf32> to vector<2x1xf32>
    %c0_i32 = arith.constant 0 : i32
    %26 = vector.broadcast %c0_i32 : i32 to vector<2x8xi32>
    %27 = arith.cmpi eq, %13, %26 : vector<2x8xi32>
    %cst_13 = arith.constant 0.000000e+00 : f32
    %28 = vector.shape_cast %25 : vector<2x1xf32> to vector<2x1xf32>
    %29 = vector.broadcast %28 : vector<2x1xf32> to vector<2x8xf32>
    %30 = vector.broadcast %cst_13 : f32 to vector<2x8xf32>
    %31 = arith.select %27, %29, %30 : vector<2x8xi1>, vector<2x8xf32>
    %32 = arith.addf %14, %31 : vector<2x8xf32>
    %33 = arith.truncf %21 : vector<2x32xf32> to vector<2x32xbf16>
    %cst_14 = arith.constant dense<0.000000e+00> : vector<2x32xf32>
    %34 = tpu.matmul %33, %0, %cst_14 {dimension_numbers = #tpu.dot_dimension_numbers<[1], [0], [0], [1], [0, 0, 1, 1], [], []>} : vector<2x32xbf16>, vector<32x32xbf16>, vector<2x32xf32> -> vector<2x32xf32>
    %35 = vector.extract_strided_slice %12 {offsets = [0, 1, 0], sizes = [2, 1, 32], strides = [1, 1, 1]} : vector<2x8x32xf32> to vector<2x1x32xf32>
    %36 = vector.shape_cast %35 : vector<2x1x32xf32> to vector<2x32xf32>
    %37 = arith.addf %36, %34 : vector<2x32xf32>
    %38 = math.tanh %37 : vector<2x32xf32>
    %39 = vector.broadcast %3 : vector<1x32xf32> to vector<2x32xf32>
    %40 = arith.mulf %38, %39 : vector<2x32xf32>
    %cst_15 = arith.constant dense<0.000000e+00> : vector<2xf32>
    %41 = vector.multi_reduction <add>, %40, %cst_15 [1] : vector<2x32xf32> to vector<2xf32>
    %42 = vector.shape_cast %41 : vector<2xf32> to vector<2x1xf32>
    %c1_i32 = arith.constant 1 : i32
    %43 = vector.broadcast %c1_i32 : i32 to vector<2x8xi32>
    %44 = arith.cmpi eq, %13, %43 : vector<2x8xi32>
    %cst_16 = arith.constant 0.000000e+00 : f32
    %45 = vector.shape_cast %42 : vector<2x1xf32> to vector<2x1xf32>
    %46 = vector.broadcast %45 : vector<2x1xf32> to vector<2x8xf32>
    %47 = vector.broadcast %cst_16 : f32 to vector<2x8xf32>
    %48 = arith.select %44, %46, %47 : vector<2x8xi1>, vector<2x8xf32>
    %49 = arith.addf %32, %48 : vector<2x8xf32>
    %50 = arith.truncf %38 : vector<2x32xf32> to vector<2x32xbf16>
    %cst_17 = arith.constant dense<0.000000e+00> : vector<2x32xf32>
    %51 = tpu.matmul %50, %0, %cst_17 {dimension_numbers = #tpu.dot_dimension_numbers<[1], [0], [0], [1], [0, 0, 1, 1], [], []>} : vector<2x32xbf16>, vector<32x32xbf16>, vector<2x32xf32> -> vector<2x32xf32>
    %52 = vector.extract_strided_slice %12 {offsets = [0, 2, 0], sizes = [2, 1, 32], strides = [1, 1, 1]} : vector<2x8x32xf32> to vector<2x1x32xf32>
    %53 = vector.shape_cast %52 : vector<2x1x32xf32> to vector<2x32xf32>
    %54 = arith.addf %53, %51 : vector<2x32xf32>
    %55 = math.tanh %54 : vector<2x32xf32>
    %56 = vector.broadcast %3 : vector<1x32xf32> to vector<2x32xf32>
    %57 = arith.mulf %55, %56 : vector<2x32xf32>
    %cst_18 = arith.constant dense<0.000000e+00> : vector<2xf32>
    %58 = vector.multi_reduction <add>, %57, %cst_18 [1] : vector<2x32xf32> to vector<2xf32>
    %59 = vector.shape_cast %58 : vector<2xf32> to vector<2x1xf32>
    %c2_i32 = arith.constant 2 : i32
    %60 = vector.broadcast %c2_i32 : i32 to vector<2x8xi32>
    %61 = arith.cmpi eq, %13, %60 : vector<2x8xi32>
    %cst_19 = arith.constant 0.000000e+00 : f32
    %62 = vector.shape_cast %59 : vector<2x1xf32> to vector<2x1xf32>
    %63 = vector.broadcast %62 : vector<2x1xf32> to vector<2x8xf32>
    %64 = vector.broadcast %cst_19 : f32 to vector<2x8xf32>
    %65 = arith.select %61, %63, %64 : vector<2x8xi1>, vector<2x8xf32>
    %66 = arith.addf %49, %65 : vector<2x8xf32>
    %67 = arith.truncf %55 : vector<2x32xf32> to vector<2x32xbf16>
    %cst_20 = arith.constant dense<0.000000e+00> : vector<2x32xf32>
    %68 = tpu.matmul %67, %0, %cst_20 {dimension_numbers = #tpu.dot_dimension_numbers<[1], [0], [0], [1], [0, 0, 1, 1], [], []>} : vector<2x32xbf16>, vector<32x32xbf16>, vector<2x32xf32> -> vector<2x32xf32>
    %69 = vector.extract_strided_slice %12 {offsets = [0, 3, 0], sizes = [2, 1, 32], strides = [1, 1, 1]} : vector<2x8x32xf32> to vector<2x1x32xf32>
    %70 = vector.shape_cast %69 : vector<2x1x32xf32> to vector<2x32xf32>
    %71 = arith.addf %70, %68 : vector<2x32xf32>
    %72 = math.tanh %71 : vector<2x32xf32>
    %73 = vector.broadcast %3 : vector<1x32xf32> to vector<2x32xf32>
    %74 = arith.mulf %72, %73 : vector<2x32xf32>
    %cst_21 = arith.constant dense<0.000000e+00> : vector<2xf32>
    %75 = vector.multi_reduction <add>, %74, %cst_21 [1] : vector<2x32xf32> to vector<2xf32>
    %76 = vector.shape_cast %75 : vector<2xf32> to vector<2x1xf32>
    %c3_i32 = arith.constant 3 : i32
    %77 = vector.broadcast %c3_i32 : i32 to vector<2x8xi32>
    %78 = arith.cmpi eq, %13, %77 : vector<2x8xi32>
    %cst_22 = arith.constant 0.000000e+00 : f32
    %79 = vector.shape_cast %76 : vector<2x1xf32> to vector<2x1xf32>
    %80 = vector.broadcast %79 : vector<2x1xf32> to vector<2x8xf32>
    %81 = vector.broadcast %cst_22 : f32 to vector<2x8xf32>
    %82 = arith.select %78, %80, %81 : vector<2x8xi1>, vector<2x8xf32>
    %83 = arith.addf %66, %82 : vector<2x8xf32>
    %84 = arith.truncf %72 : vector<2x32xf32> to vector<2x32xbf16>
    %cst_23 = arith.constant dense<0.000000e+00> : vector<2x32xf32>
    %85 = tpu.matmul %84, %0, %cst_23 {dimension_numbers = #tpu.dot_dimension_numbers<[1], [0], [0], [1], [0, 0, 1, 1], [], []>} : vector<2x32xbf16>, vector<32x32xbf16>, vector<2x32xf32> -> vector<2x32xf32>
    %86 = vector.extract_strided_slice %12 {offsets = [0, 4, 0], sizes = [2, 1, 32], strides = [1, 1, 1]} : vector<2x8x32xf32> to vector<2x1x32xf32>
    %87 = vector.shape_cast %86 : vector<2x1x32xf32> to vector<2x32xf32>
    %88 = arith.addf %87, %85 : vector<2x32xf32>
    %89 = math.tanh %88 : vector<2x32xf32>
    %90 = vector.broadcast %3 : vector<1x32xf32> to vector<2x32xf32>
    %91 = arith.mulf %89, %90 : vector<2x32xf32>
    %cst_24 = arith.constant dense<0.000000e+00> : vector<2xf32>
    %92 = vector.multi_reduction <add>, %91, %cst_24 [1] : vector<2x32xf32> to vector<2xf32>
    %93 = vector.shape_cast %92 : vector<2xf32> to vector<2x1xf32>
    %c4_i32 = arith.constant 4 : i32
    %94 = vector.broadcast %c4_i32 : i32 to vector<2x8xi32>
    %95 = arith.cmpi eq, %13, %94 : vector<2x8xi32>
    %cst_25 = arith.constant 0.000000e+00 : f32
    %96 = vector.shape_cast %93 : vector<2x1xf32> to vector<2x1xf32>
    %97 = vector.broadcast %96 : vector<2x1xf32> to vector<2x8xf32>
    %98 = vector.broadcast %cst_25 : f32 to vector<2x8xf32>
    %99 = arith.select %95, %97, %98 : vector<2x8xi1>, vector<2x8xf32>
    %100 = arith.addf %83, %99 : vector<2x8xf32>
    %101 = arith.truncf %89 : vector<2x32xf32> to vector<2x32xbf16>
    %cst_26 = arith.constant dense<0.000000e+00> : vector<2x32xf32>
    %102 = tpu.matmul %101, %0, %cst_26 {dimension_numbers = #tpu.dot_dimension_numbers<[1], [0], [0], [1], [0, 0, 1, 1], [], []>} : vector<2x32xbf16>, vector<32x32xbf16>, vector<2x32xf32> -> vector<2x32xf32>
    %103 = vector.extract_strided_slice %12 {offsets = [0, 5, 0], sizes = [2, 1, 32], strides = [1, 1, 1]} : vector<2x8x32xf32> to vector<2x1x32xf32>
    %104 = vector.shape_cast %103 : vector<2x1x32xf32> to vector<2x32xf32>
    %105 = arith.addf %104, %102 : vector<2x32xf32>
    %106 = math.tanh %105 : vector<2x32xf32>
    %107 = vector.broadcast %3 : vector<1x32xf32> to vector<2x32xf32>
    %108 = arith.mulf %106, %107 : vector<2x32xf32>
    %cst_27 = arith.constant dense<0.000000e+00> : vector<2xf32>
    %109 = vector.multi_reduction <add>, %108, %cst_27 [1] : vector<2x32xf32> to vector<2xf32>
    %110 = vector.shape_cast %109 : vector<2xf32> to vector<2x1xf32>
    %c5_i32 = arith.constant 5 : i32
    %111 = vector.broadcast %c5_i32 : i32 to vector<2x8xi32>
    %112 = arith.cmpi eq, %13, %111 : vector<2x8xi32>
    %cst_28 = arith.constant 0.000000e+00 : f32
    %113 = vector.shape_cast %110 : vector<2x1xf32> to vector<2x1xf32>
    %114 = vector.broadcast %113 : vector<2x1xf32> to vector<2x8xf32>
    %115 = vector.broadcast %cst_28 : f32 to vector<2x8xf32>
    %116 = arith.select %112, %114, %115 : vector<2x8xi1>, vector<2x8xf32>
    %117 = arith.addf %100, %116 : vector<2x8xf32>
    %118 = arith.truncf %106 : vector<2x32xf32> to vector<2x32xbf16>
    %cst_29 = arith.constant dense<0.000000e+00> : vector<2x32xf32>
    %119 = tpu.matmul %118, %0, %cst_29 {dimension_numbers = #tpu.dot_dimension_numbers<[1], [0], [0], [1], [0, 0, 1, 1], [], []>} : vector<2x32xbf16>, vector<32x32xbf16>, vector<2x32xf32> -> vector<2x32xf32>
    %120 = vector.extract_strided_slice %12 {offsets = [0, 6, 0], sizes = [2, 1, 32], strides = [1, 1, 1]} : vector<2x8x32xf32> to vector<2x1x32xf32>
    %121 = vector.shape_cast %120 : vector<2x1x32xf32> to vector<2x32xf32>
    %122 = arith.addf %121, %119 : vector<2x32xf32>
    %123 = math.tanh %122 : vector<2x32xf32>
    %124 = vector.broadcast %3 : vector<1x32xf32> to vector<2x32xf32>
    %125 = arith.mulf %123, %124 : vector<2x32xf32>
    %cst_30 = arith.constant dense<0.000000e+00> : vector<2xf32>
    %126 = vector.multi_reduction <add>, %125, %cst_30 [1] : vector<2x32xf32> to vector<2xf32>
    %127 = vector.shape_cast %126 : vector<2xf32> to vector<2x1xf32>
    %c6_i32 = arith.constant 6 : i32
    %128 = vector.broadcast %c6_i32 : i32 to vector<2x8xi32>
    %129 = arith.cmpi eq, %13, %128 : vector<2x8xi32>
    %cst_31 = arith.constant 0.000000e+00 : f32
    %130 = vector.shape_cast %127 : vector<2x1xf32> to vector<2x1xf32>
    %131 = vector.broadcast %130 : vector<2x1xf32> to vector<2x8xf32>
    %132 = vector.broadcast %cst_31 : f32 to vector<2x8xf32>
    %133 = arith.select %129, %131, %132 : vector<2x8xi1>, vector<2x8xf32>
    %134 = arith.addf %117, %133 : vector<2x8xf32>
    %135 = arith.truncf %123 : vector<2x32xf32> to vector<2x32xbf16>
    %cst_32 = arith.constant dense<0.000000e+00> : vector<2x32xf32>
    %136 = tpu.matmul %135, %0, %cst_32 {dimension_numbers = #tpu.dot_dimension_numbers<[1], [0], [0], [1], [0, 0, 1, 1], [], []>} : vector<2x32xbf16>, vector<32x32xbf16>, vector<2x32xf32> -> vector<2x32xf32>
    %137 = vector.extract_strided_slice %12 {offsets = [0, 7, 0], sizes = [2, 1, 32], strides = [1, 1, 1]} : vector<2x8x32xf32> to vector<2x1x32xf32>
    %138 = vector.shape_cast %137 : vector<2x1x32xf32> to vector<2x32xf32>
    %139 = arith.addf %138, %136 : vector<2x32xf32>
    %140 = math.tanh %139 : vector<2x32xf32>
    %141 = vector.broadcast %3 : vector<1x32xf32> to vector<2x32xf32>
    %142 = arith.mulf %140, %141 : vector<2x32xf32>
    %cst_33 = arith.constant dense<0.000000e+00> : vector<2xf32>
    %143 = vector.multi_reduction <add>, %142, %cst_33 [1] : vector<2x32xf32> to vector<2xf32>
    %144 = vector.shape_cast %143 : vector<2xf32> to vector<2x1xf32>
    %c7_i32 = arith.constant 7 : i32
    %145 = vector.broadcast %c7_i32 : i32 to vector<2x8xi32>
    %146 = arith.cmpi eq, %13, %145 : vector<2x8xi32>
    %cst_34 = arith.constant 0.000000e+00 : f32
    %147 = vector.shape_cast %144 : vector<2x1xf32> to vector<2x1xf32>
    %148 = vector.broadcast %147 : vector<2x1xf32> to vector<2x8xf32>
    %149 = vector.broadcast %cst_34 : f32 to vector<2x8xf32>
    %150 = arith.select %146, %148, %149 : vector<2x8xi1>, vector<2x8xf32>
    %151 = arith.addf %134, %150 : vector<2x8xf32>
    %c0_35 = arith.constant 0 : index
    %c0_36 = arith.constant 0 : index
    %152 = vector.load %arg8[%c0_35, %c0_36] : memref<2x32xf32, #tpu.memory_space<vmem>>, vector<2x32xf32>
    tpu.vector_store %arg8[%c0_35, %c0_36], %140 {strides = array<i32>} : memref<2x32xf32, #tpu.memory_space<vmem>>, vector<2x32xf32>,
    %c0_37 = arith.constant 0 : index
    %153 = memref.load %arg6[%c0_37] : memref<1xf32, #tpu.memory_space<smem>>
    %154 = vector.broadcast %153 : f32 to vector<2x8xf32>
    %155 = arith.addf %151, %154 : vector<2x8xf32>
    %c0_38 = arith.constant 0 : index
    %c0_39 = arith.constant 0 : index
    %156 = vector.load %arg7[%c0_38, %c0_39] : memref<2x8xf32, #tpu.memory_space<vmem>>, vector<2x8xf32>
    tpu.vector_store %arg7[%c0_38, %c0_39], %155 {strides = array<i32>} : memref<2x8xf32, #tpu.memory_space<vmem>>, vector<2x8xf32>,
    return
  }
}

</mosaic_0001>

<bundles_post_ra>
// kernel: tpu_custom_call.1
= control target key start
LH: loop header
LB: loop body
LE: loop exit
PB: predicated region body
PF: predicated region fallthrough
CT: control target
= control target key end

     0   :  { %15 = vsyncpa [#allocation4], 0  ;;  %s1207_s0 = inlined_call_operand.vmem [shape: f32[2,8], index: 0, kind: input, shape index: {}]   ;;  %s1208_s1 = inlined_call_operand.vmem [shape: f32[2,32], index: 1, kind: input, shape index: {}]   ;;  %s1209_s2 = inlined_call_operand.vmem [shape: f32[1,32], index: 2, kind: input, shape index: {}]   ;;  %s1210_s3 = inlined_call_operand.hbm [shape: bf16[32,32], index: 3, kind: input, shape index: {}]   ;;  %s1211_s4 = inlined_call_operand.vmem [shape: f32[1,32], index: 4, kind: input, shape index: {}]   ;;  %s1212_s5 = inlined_call_operand.vmem [shape: f32[1,32], index: 5, kind: input, shape index: {}]   ;;  %s1213_s6 = inlined_call_operand.<no memory space> [shape: f32[1], index: 6, kind: input, shape index: {}]   ;;  %s1214_s7 = inlined_call_operand.hbm [shape: f32[2,8], index: 7, kind: output, shape index: {0}]   ;;  %s1215_s8 = inlined_call_operand.hbm [shape: f32[2,32], index: 8, kind: output, shape index: {1}]  }
   0x1   :  { %16 = vsyncpa [#allocation5], 0 }
   0x2   :  { %17 = vsyncpa [#allocation8], 0  ;;  %s993_s27 = smov [#allocation3]   ;;  %s921_s9 = scalar_lea.hbm %s1210_s3, 256 }
   0x3   :  { %s29_s28 = sshll.u32 %s993_s27, 4  ;;  %p922_p0 = scmp.ne.s32.totalorder %s1210_s3, %s921_s9  ;;  %s30_s28 = int_to_ptr.vmem [resolvable:$true] %s29_s28 }
   0x4   :  { %p925_p1 = scmp.lt.u32.totalorder %s921_s9, %s1210_s3 }
   0x6   :  { %p927_p2 = pnand %p925_p1, %p922_p0 }
   0x8   :  { %930 = shalt.err (!%p927_p2)
}
   0x9   :  { %s931_s14 = scalar_lea.vmem %s30_s28, 256  ;;  %p936_p4 = scmp.lt.s32.totalorder %s30_s28, %s30_s28 }
   0xa   :  { %p932_p3 = scmp.ne.s32.totalorder %s30_s28, %s931_s14  ;;  %p937_p5 = scmp.lt.s32.totalorder %s931_s14, %s931_s14 }
   0xc   :  { %p938_p6 = por %p937_p5, %p936_p4 }
   0xe   :  { %p939_p7 = pnand %p938_p6, %p932_p3 }
  0x10   :  { %942 = shalt.err (!%p939_p7)
}
  0x11   :  { %s994_s15 = smov 64   ;;  %s995_s16 = smov 4  }
  0x12   :  { %35 = dma.hbm_to_vmem [thread:$0]  %s1210_s3, 256, %s30_s28, [#allocation4], %s994_s15, %s994_s15, %s995_s16  }
  0x13   :  { %987 = dma.done.wait [#allocation4], 256  }
  0x14   :  { %988 = vsyncadd [#allocation4], 4294967040  ;;  %v54_v0 = vlaneseq  ;;  %v996_v1 = vmov 0.0   ;;  %vm997_vm0 = vmmov 0   ;;  %v1064_v4 = vld [vmem:[#allocation3] sm:$0xff]   ;;  %v1067_v6 = vld [vmem:[#allocation3 + $0x8] sm:$0xff]  }
  0x15   :  { %816 = vmatprep.subr.bf16.mxu0 %v996_v1  ;;  %820 = vmatprep.mubr.msk.bf16.mxu0 %vm997_vm0, %v996_v1  ;;  %v86_v7 = vld [vmem:[%s1208_s1] sm:$0x3]  ;;  %vm100_vm1 = vcmask 261120   ;;  %vm163_vm2 = vcmask 1041409   ;;  %vm166_vm3 = vcmask 254976   ;;  %vm238_vm4 = vcmask 1042434  }
  0x16   :  { %v55_v2 = vshrl.u32 %v54_v0, 7  ;;  %824 = vmatprep.subr.bf16.mxu1 %v996_v1  ;;  %828 = vmatprep.mubr.msk.bf16.mxu1 %vm997_vm0, %v996_v1  ;;  %v53_v8 = vld [vmem:[%s1207_s0] sm:$0x3]  ;;  %v87_v10 = vpack.c.bf16 %v86_v7, %v86_v7  ;;  %vm241_vm5 = vcmask 256001   ;;  %vm317_vm6 = vcmask 1043459  }
  0x17   :  { %817 = vmatpush3.bf16.msra.mxu0 %v1064_v4  ;;  %825 = vmatpush3.bf16.msra.mxu1 %v1064_v4  ;;  %v779_v13 = vld [vmem:[%s1209_s2] ss:$0 sm:$0xff]  ;;  %vm320_vm7 = vcmask 257026   ;;  %vm397_vm8 = vcmask 1044484   ;;  %vm400_vm9 = vcmask 258051   ;;  %vm477_vm10 = vcmask 1045509  }
  0x18   :  { %v63_v3 = vsub.s32 1, %v55_v2  ;;  %v56_v5 = vsub.s32 0, %v55_v2  ;;  %818 = vmatprep.subr.bf16.mxu0 %v996_v1  ;;  %826 = vmatprep.subr.bf16.mxu1 %v996_v1  ;;  %v780_v16 = vld [vmem:[%s1211_s4] ss:$0 sm:$0xff]  ;;  %vm480_vm11 = vcmask 259076   ;;  %vm557_vm12 = vcmask 1046534  }
  0x19   :  { %v1104_v29 = vld [vmem:[%s1212_s5] ss:$0 sm:$0xff]  ;;  %vm560_vm13 = vcmask 260101   ;;  %vm637_vm14 = vcmask 1047559   ;;  %vm640_vm15 = vcmask 261126   ;;  %s998_s5 = smov [#allocation7]  }
  0x1a   :  { %v64_v9 = vrot.slane %v53_v8, %v63_v3  ;;  %v57_v11 = vrot.slane %v53_v8, %v56_v5  ;;  %s766_s24 = sshll.u32 %s998_s5, 4  ;;  %s767_s24 = int_to_ptr.vmem [resolvable:$true] %s766_s24 }
  0x1b   :  { %819 = vmatpush3.bf16.msra.mxu0 %v1067_v6  ;;  %827 = vmatpush3.bf16.msra.mxu1 %v1067_v6  ;;  %s943_s25 = scalar_lea.vmem %s767_s24, 32  ;;  %p948_p9 = scmp.lt.s32.totalorder %s767_s24, %s767_s24 }
  0x1c   :  { %66 = vbcast.lane.b32.xlu0 %v64_v9, 256  ;;  %832 = vmatprep.subr.bf16.mxu0 %v996_v1  ;;  %p944_p8 = scmp.ne.s32.totalorder %s767_s24, %s943_s25  ;;  %p949_p10 = scmp.lt.s32.totalorder %s943_s25, %s943_s25 }
  0x1d   :  { %840 = vmatprep.subr.bf16.mxu1 %v996_v1 }
  0x1e   :  { %821 = vmatmul.mubr.msk.bf16.vlgmr.msra.gmra.mrb[0].mxu0 %vm100_vm1, %v87_v10  ;;  %p950_p11 = por %p949_p10, %p948_p9 }
  0x1f   :  { %833 = vmatpush3.bf16.msra.mxu0 %v1064_v4  ;;  %836 = vmatprep.mubr.msk.bf16.mxu0 %vm997_vm0, %v996_v1 }
  0x20   :  { %59 = vbcast.lane.b32.xlu0 %v57_v11, 256  ;;  %834 = vmatprep.subr.bf16.mxu0 %v996_v1  ;;  %p951_p12 = pnand %p950_p11, %p944_p8 }
  0x23   :  { %835 = vmatpush3.bf16.msra.mxu0 %v1067_v6 }
  0x24   :  { %848 = vmatprep.subr.bf16.mxu0 %v996_v1 }
  0x8e   :  { %v67_v12 = vpop.permute.xlu0 %66 }
  0x8f   :  { %v75_v17 = vmul.f32 %v779_v13, %v67_v12 }
  0x91   :  { %v1097_v20 = vadd.f32 %v780_v16, %v75_v17 }
  0x92   :  { %v60_v14 = vpop.permute.xlu0 %59 }
  0x93   :  { %v74_v15 = vmul.f32 %v779_v13, %v60_v14 }
  0x95   :  { %v1095_v18 = vadd.f32 %v780_v16, %v74_v15 }
  0xf1   :  { %v138_v19 = vpop.f32.mrb[0].mxu0 }
  0xf2   :  { %v145_v21 = vrot.slane %v138_v19, 1  ;;  %v148_v22 = vadd.f32 %v138_v19, %v1095_v18  ;;  %v822_v23 = vpop.f32.mrb[1].mxu0 }
  0xf3   :  { %v141_v24 = vpop.f32.mrb[2].mxu0 }
  0xf4   :  { %v149_v25 = vadd.f32 %v145_v21, %v1097_v20  ;;  %889 = vtanh.f32 %v148_v22  ;;  %v823_v26 = vpop.f32.mrb[3].mxu0 }
  0xf6   :  { %891 = vtanh.f32 %v149_v25 }
  0xfe   :  { %v890_v27 = vpop.eup %889 }
  0xff   :  { %v173_v31 = vpack.c.bf16 %v890_v27, %v890_v27  ;;  %v158_v33 = vmul.f32 %v890_v27, %v1104_v29 }
 0x100   :  { %v892_v28 = vpop.eup %891 }
 0x101   :  { %v159_v30 = vmul.f32 %v892_v28, %v1104_v29  ;;  %v174_v32 = vpack.c.bf16 %v892_v28, %v892_v28  ;;  %v177_v37 = vunpack.c.l.b16 %v173_v31 }
 0x103   :  { %v162_v34 = vrot.slane %v159_v30, 7  ;;  %v178_v35 = vunpack.c.l.b16 %v174_v32 }
 0x105   :  { %v164_v36 = vsel %vm163_vm2, %v162_v34, %v158_v33  ;;  %v179_v38 = vrot.slane %v178_v35, 7 }
 0x106   :  { %v167_v39 = vsel %vm166_vm3, %v164_v36, 0.0 }
 0x107   :  { %168 = vadd.xlane.f32.xlu1 %v167_v39  ;;  %v180_v40 = vsel %vm163_vm2, %v179_v38, %v177_v37 }
 0x108   :  { %v181_v41 = vpack.c.b16 %v180_v40, %v180_v40 }
 0x10a   :  { %829 = vmatmul.mubr.msk.bf16.vlgmr.msra.gmra.mrb[0].mxu1 %vm100_vm1, %v181_v41 }
 0x10b   :  { %841 = vmatpush3.bf16.msra.mxu1 %v1064_v4  ;;  %844 = vmatprep.mubr.msk.bf16.mxu1 %vm997_vm0, %v996_v1 }
 0x10c   :  { %842 = vmatprep.subr.bf16.mxu1 %v996_v1 }
 0x10f   :  { %843 = vmatpush3.bf16.msra.mxu1 %v1067_v6 }
 0x110   :  { %856 = vmatprep.subr.bf16.mxu1 %v996_v1 }
 0x1dd   :  { %v219_v42 = vpop.f32.mrb[0].mxu1 }
 0x1de   :  { %v226_v43 = vrot.slane %v219_v42, 7  ;;  %v230_v44 = vadd.f32 %v219_v42, %v1097_v20  ;;  %v830_v45 = vpop.f32.mrb[1].mxu1 }
 0x1df   :  { %v222_v46 = vpop.f32.mrb[2].mxu1 }
 0x1e0   :  { %v229_v47 = vadd.f32 %v226_v43, %v1095_v18  ;;  %893 = vtanh.f32 %v230_v44  ;;  %v831_v48 = vpop.f32.mrb[3].mxu1 }
 0x1e2   :  { %895 = vtanh.f32 %v229_v47 }
 0x1ea   :  { %v894_v49 = vpop.eup %893 }
 0x1eb   :  { %v234_v50 = vmul.f32 %v894_v49, %v1104_v29  ;;  %v252_v53 = vpack.c.bf16 %v894_v49, %v894_v49 }
 0x1ec   :  { %v896_v51 = vpop.eup %895 }
 0x1ed   :  { %v251_v52 = vpack.c.bf16 %v896_v51, %v896_v51  ;;  %v233_v54 = vmul.f32 %v896_v51, %v1104_v29  ;;  %v237_v55 = vrot.slane %v234_v50, 7  ;;  %v256_v59 = vunpack.c.l.b16 %v252_v53 }
 0x1ef   :  { %v255_v56 = vunpack.c.l.b16 %v251_v52  ;;  %v239_v57 = vsel %vm238_vm4, %v237_v55, %v233_v54 }
 0x1f0   :  { %v242_v58 = vsel %vm241_vm5, %v239_v57, 0.0 }
 0x1f1   :  { %v257_v60 = vrot.slane %v255_v56, 1  ;;  %243 = vadd.xlane.f32.xlu1 %v242_v58 }
 0x1f3   :  { %v258_v61 = vsel %vm163_vm2, %v256_v59, %v257_v60 }
 0x1f4   :  { %v259_v62 = vpack.c.b16 %v258_v61, %v258_v61 }
 0x1f6   :  { %837 = vmatmul.mubr.msk.bf16.vlgmr.msra.gmra.mrb[4].mxu0 %vm100_vm1, %v259_v62 }
 0x1f7   :  { %849 = vmatpush3.bf16.msra.mxu0 %v1064_v4  ;;  %852 = vmatprep.mubr.msk.bf16.mxu0 %vm997_vm0, %v996_v1 }
 0x1f8   :  { %850 = vmatprep.subr.bf16.mxu0 %v996_v1 }
 0x1fb   :  { %851 = vmatpush3.bf16.msra.mxu0 %v1067_v6 }
 0x1fc   :  { %864 = vmatprep.subr.bf16.mxu0 %v996_v1 }
 0x2c9   :  { %v297_v63 = vpop.f32.mrb[4].mxu0 }
 0x2ca   :  { %v304_v2 = vrot.slane %v297_v63, 6  ;;  %v305_v3 = vrot.slane %v297_v63, 7  ;;  %v838_v5 = vpop.f32.mrb[5].mxu0 }
 0x2cb   :  { %v300_v7 = vpop.f32.mrb[6].mxu0 }
 0x2cc   :  { %v308_v8 = vadd.f32 %v304_v2, %v1095_v18  ;;  %v309_v9 = vadd.f32 %v305_v3, %v1097_v20  ;;  %v839_v10 = vpop.f32.mrb[7].mxu0 }
 0x2ce   :  { %897 = vtanh.f32 %v308_v8 }
 0x2cf   :  { %899 = vtanh.f32 %v309_v9 }
 0x2d8   :  { %v898_v11 = vpop.eup %897 }
 0x2d9   :  { %v900_v12 = vpop.eup %899  ;;  %v330_v13 = vpack.c.bf16 %v898_v11, %v898_v11  ;;  %v312_v19 = vmul.f32 %v898_v11, %v1104_v29 }
 0x2da   :  { %v331_v14 = vpack.c.bf16 %v900_v12, %v900_v12  ;;  %v313_v15 = vmul.f32 %v900_v12, %v1104_v29 }
 0x2db   :  { %v334_v16 = vunpack.c.l.b16 %v330_v13 }
 0x2dc   :  { %v335_v17 = vunpack.c.l.b16 %v331_v14  ;;  %v316_v21 = vrot.slane %v313_v15, 7 }
 0x2dd   :  { %v336_v22 = vrot.slane %v334_v16, 2 }
 0x2de   :  { %v337_v23 = vrot.slane %v335_v17, 1  ;;  %v318_v24 = vsel %vm317_vm6, %v316_v21, %v312_v19 }
 0x2df   :  { %v321_v25 = vsel %vm320_vm7, %v318_v24, 0.0 }
 0x2e0   :  { %322 = vadd.xlane.f32.xlu0 %v321_v25  ;;  %v338_v26 = vsel %vm163_vm2, %v337_v23, %v336_v22 }
 0x2e1   :  { %v339_v27 = vpack.c.b16 %v338_v26, %v338_v26 }
 0x2e3   :  { %845 = vmatmul.mubr.msk.bf16.vlgmr.msra.gmra.mrb[4].mxu1 %vm100_vm1, %v339_v27 }
 0x2e4   :  { %857 = vmatpush3.bf16.msra.mxu1 %v1064_v4  ;;  %860 = vmatprep.mubr.msk.bf16.mxu1 %vm997_vm0, %v996_v1 }
 0x2e5   :  { %858 = vmatprep.subr.bf16.mxu1 %v996_v1 }
 0x2e8   :  { %859 = vmatpush3.bf16.msra.mxu1 %v1067_v6 }
 0x2e9   :  { %872 = vmatprep.subr.bf16.mxu1 %v996_v1 }
 0x3b6   :  { %v377_v28 = vpop.f32.mrb[4].mxu1 }
 0x3b7   :  { %v384_v30 = vrot.slane %v377_v28, 5  ;;  %v385_v31 = vrot.slane %v377_v28, 6  ;;  %v846_v32 = vpop.f32.mrb[5].mxu1 }
 0x3b8   :  { %v380_v33 = vpop.f32.mrb[6].mxu1 }
 0x3b9   :  { %v388_v34 = vadd.f32 %v384_v30, %v1095_v18  ;;  %v389_v35 = vadd.f32 %v385_v31, %v1097_v20  ;;  %v847_v36 = vpop.f32.mrb[7].mxu1 }
 0x3bb   :  { %901 = vtanh.f32 %v388_v34 }
 0x3bc   :  { %903 = vtanh.f32 %v389_v35 }
 0x3c5   :  { %v902_v37 = vpop.eup %901 }
 0x3c6   :  { %v904_v38 = vpop.eup %903  ;;  %v410_v39 = vpack.c.bf16 %v902_v37, %v902_v37  ;;  %v392_v44 = vmul.f32 %v902_v37, %v1104_v29 }
 0x3c7   :  { %v411_v40 = vpack.c.bf16 %v904_v38, %v904_v38  ;;  %v393_v41 = vmul.f32 %v904_v38, %v1104_v29 }
 0x3c8   :  { %v414_v42 = vunpack.c.l.b16 %v410_v39 }
 0x3c9   :  { %v415_v43 = vunpack.c.l.b16 %v411_v40  ;;  %v396_v45 = vrot.slane %v393_v41, 7 }
 0x3ca   :  { %v416_v46 = vrot.slane %v414_v42, 3 }
 0x3cb   :  { %v417_v47 = vrot.slane %v415_v43, 2  ;;  %v398_v48 = vsel %vm397_vm8, %v396_v45, %v392_v44 }
 0x3cc   :  { %v401_v49 = vsel %vm400_vm9, %v398_v48, 0.0 }
 0x3cd   :  { %402 = vadd.xlane.f32.xlu1 %v401_v49  ;;  %v418_v50 = vsel %vm163_vm2, %v417_v47, %v416_v46 }
 0x3ce   :  { %v419_v51 = vpack.c.b16 %v418_v50, %v418_v50 }
 0x3d0   :  { %853 = vmatmul.mubr.msk.bf16.vlgmr.msra.gmra.mrb[8].mxu0 %vm100_vm1, %v419_v51 }
 0x3d1   :  { %865 = vmatpush3.bf16.msra.mxu0 %v1064_v4  ;;  %868 = vmatprep.mubr.msk.bf16.mxu0 %vm997_vm0, %v996_v1 }
 0x3d2   :  { %866 = vmatprep.subr.bf16.mxu0 %v996_v1 }
 0x3d5   :  { %867 = vmatpush3.bf16.msra.mxu0 %v1067_v6 }
 0x4a3   :  { %v457_v52 = vpop.f32.mrb[8].mxu0 }
 0x4a4   :  { %v464_v53 = vrot.slane %v457_v52, 4  ;;  %v465_v54 = vrot.slane %v457_v52, 5  ;;  %v854_v55 = vpop.f32.mrb[9].mxu0 }
 0x4a5   :  { %v460_v56 = vpop.f32.mrb[10].mxu0 }
 0x4a6   :  { %v468_v57 = vadd.f32 %v464_v53, %v1095_v18  ;;  %v469_v58 = vadd.f32 %v465_v54, %v1097_v20  ;;  %v855_v59 = vpop.f32.mrb[11].mxu0 }
 0x4a8   :  { %905 = vtanh.f32 %v468_v57 }
 0x4a9   :  { %907 = vtanh.f32 %v469_v58 }
 0x4b2   :  { %v906_v60 = vpop.eup %905 }
 0x4b3   :  { %v908_v61 = vpop.eup %907  ;;  %v490_v62 = vpack.c.bf16 %v906_v60, %v906_v60  ;;  %v472_v7 = vmul.f32 %v906_v60, %v1104_v29 }
 0x4b4   :  { %v491_v63 = vpack.c.bf16 %v908_v61, %v908_v61  ;;  %v473_v2 = vmul.f32 %v908_v61, %v1104_v29 }
 0x4b5   :  { %v494_v3 = vunpack.c.l.b16 %v490_v62 }
 0x4b6   :  { %v495_v5 = vunpack.c.l.b16 %v491_v63  ;;  %v476_v8 = vrot.slane %v473_v2, 7 }
 0x4b7   :  { %v496_v9 = vrot.slane %v494_v3, 4 }
 0x4b8   :  { %v497_v10 = vrot.slane %v495_v5, 3  ;;  %v478_v11 = vsel %vm477_vm10, %v476_v8, %v472_v7 }
 0x4b9   :  { %v481_v12 = vsel %vm480_vm11, %v478_v11, 0.0 }
 0x4ba   :  { %482 = vadd.xlane.f32.xlu1 %v481_v12  ;;  %v498_v13 = vsel %vm163_vm2, %v497_v10, %v496_v9 }
 0x4bb   :  { %v499_v14 = vpack.c.b16 %v498_v13, %v498_v13 }
 0x4bd   :  { %861 = vmatmul.mubr.msk.bf16.vlgmr.msra.gmra.mrb[8].mxu1 %vm100_vm1, %v499_v14 }
 0x4be   :  { %873 = vmatpush3.bf16.msra.mxu1 %v1064_v4  ;;  %876 = vmatprep.mubr.msk.bf16.mxu1 %vm997_vm0, %v996_v1  ;;  %vm719_vm0 = vcmask 261127  }
 0x4bf   :  { %874 = vmatprep.subr.bf16.mxu1 %v996_v1 }
 0x4c2   :  { %875 = vmatpush3.bf16.msra.mxu1 %v1067_v6 }
 0x590   :  { %v537_v15 = vpop.f32.mrb[8].mxu1 }
 0x591   :  { %v544_v16 = vrot.slane %v537_v15, 3  ;;  %v545_v17 = vrot.slane %v537_v15, 4  ;;  %v862_v19 = vpop.f32.mrb[9].mxu1 }
 0x592   :  { %v540_v21 = vpop.f32.mrb[10].mxu1 }
 0x593   :  { %v548_v22 = vadd.f32 %v544_v16, %v1095_v18  ;;  %v549_v23 = vadd.f32 %v545_v17, %v1097_v20  ;;  %v863_v24 = vpop.f32.mrb[11].mxu1 }
 0x595   :  { %909 = vtanh.f32 %v548_v22 }
 0x596   :  { %911 = vtanh.f32 %v549_v23 }
 0x59f   :  { %v910_v4 = vpop.eup %909 }
 0x5a0   :  { %v912_v25 = vpop.eup %911  ;;  %v570_v26 = vpack.c.bf16 %v910_v4, %v910_v4  ;;  %v552_v30 = vmul.f32 %v910_v4, %v1104_v29 }
 0x5a1   :  { %v571_v27 = vpack.c.bf16 %v912_v25, %v912_v25  ;;  %v553_v1 = vmul.f32 %v912_v25, %v1104_v29 }
 0x5a2   :  { %v574_v28 = vunpack.c.l.b16 %v570_v26 }
 0x5a3   :  { %v575_v6 = vunpack.c.l.b16 %v571_v27  ;;  %v556_v31 = vrot.slane %v553_v1, 7 }
 0x5a4   :  { %v576_v32 = vrot.slane %v574_v28, 5 }
 0x5a5   :  { %v577_v33 = vrot.slane %v575_v6, 4  ;;  %v558_v34 = vsel %vm557_vm12, %v556_v31, %v552_v30 }
 0x5a6   :  { %v561_v35 = vsel %vm560_vm13, %v558_v34, 0.0 }
 0x5a7   :  { %562 = vadd.xlane.f32.xlu1 %v561_v35  ;;  %v578_v36 = vsel %vm163_vm2, %v577_v33, %v576_v32 }
 0x5a8   :  { %v579_v37 = vpack.c.b16 %v578_v36, %v578_v36 }
 0x5aa   :  { %869 = vmatmul.mubr.msk.bf16.vlgmr.msra.gmra.mrb[12].mxu0 %vm100_vm1, %v579_v37 }
 0x67d   :  { %v617_v38 = vpop.f32.mrb[12].mxu0 }
 0x67e   :  { %v624_v39 = vrot.slane %v617_v38, 2  ;;  %v625_v40 = vrot.slane %v617_v38, 3  ;;  %v870_v41 = vpop.f32.mrb[13].mxu0 }
 0x67f   :  { %v620_v42 = vpop.f32.mrb[14].mxu0 }
 0x680   :  { %v628_v43 = vadd.f32 %v624_v39, %v1095_v18  ;;  %v629_v44 = vadd.f32 %v625_v40, %v1097_v20  ;;  %v871_v45 = vpop.f32.mrb[15].mxu0 }
 0x682   :  { %913 = vtanh.f32 %v628_v43 }
 0x683   :  { %915 = vtanh.f32 %v629_v44 }
 0x68c   :  { %v914_v46 = vpop.eup %913 }
 0x68d   :  { %v916_v47 = vpop.eup %915  ;;  %v650_v48 = vpack.c.bf16 %v914_v46, %v914_v46  ;;  %v632_v53 = vmul.f32 %v914_v46, %v1104_v29 }
 0x68e   :  { %v651_v49 = vpack.c.bf16 %v916_v47, %v916_v47  ;;  %v633_v50 = vmul.f32 %v916_v47, %v1104_v29 }
 0x68f   :  { %v654_v51 = vunpack.c.l.b16 %v650_v48 }
 0x690   :  { %v655_v52 = vunpack.c.l.b16 %v651_v49  ;;  %v636_v54 = vrot.slane %v633_v50, 7 }
 0x691   :  { %v656_v55 = vrot.slane %v654_v51, 6 }
 0x692   :  { %v657_v56 = vrot.slane %v655_v52, 5  ;;  %v638_v57 = vsel %vm637_vm14, %v636_v54, %v632_v53 }
 0x693   :  { %v641_v58 = vsel %vm640_vm15, %v638_v57, 0.0 }
 0x694   :  { %642 = vadd.xlane.f32.xlu1 %v641_v58  ;;  %v658_v59 = vsel %vm163_vm2, %v657_v56, %v656_v55  ;;  %vm723_vm2 = vcmask 253952  }
 0x695   :  { %v659_v60 = vpack.c.b16 %v658_v59, %v658_v59 }
 0x697   :  { %877 = vmatmul.mubr.msk.bf16.vlgmr.msra.gmra.mrb[12].mxu1 %vm100_vm1, %v659_v60 }
 0x76a   :  { %v697_v61 = vpop.f32.mrb[12].mxu1 }
 0x76b   :  { %v704_v62 = vrot.slane %v697_v61, 1  ;;  %v705_v63 = vrot.slane %v697_v61, 2  ;;  %v878_v2 = vpop.f32.mrb[13].mxu1 }
 0x76c   :  { %v700_v3 = vpop.f32.mrb[14].mxu1 }
 0x76d   :  { %v708_v5 = vadd.f32 %v704_v62, %v1095_v18  ;;  %v709_v7 = vadd.f32 %v705_v63, %v1097_v20  ;;  %v879_v8 = vpop.f32.mrb[15].mxu1 }
 0x76f   :  { %917 = vtanh.f32 %v708_v5 }
 0x770   :  { %919 = vtanh.f32 %v709_v7 }
 0x779   :  { %v918_v9 = vpop.eup %917 }
 0x77a   :  { %v920_v10 = vpop.eup %919  ;;  %v712_v11 = vmul.f32 %v918_v9, %v1104_v29  ;;  %743 = vst.msk [vmem:[#allocation7 - $0x7] sm:$0x80] %vm719_vm0, %v918_v9 }
 0x77b   :  { %v713_v12 = vmul.f32 %v920_v10, %v1104_v29  ;;  %v740_v13 = vrot.slane %v920_v10, 7 }
 0x77c   :  { %v720_v14 = vsel %vm719_vm0, %v712_v11, 0.0 }
 0x77d   :  { %721 = vadd.xlane.f32.xlu1 %v720_v14  ;;  %v716_v15 = vrot.slane %v713_v12, 7  ;;  %744 = vst.msk [vmem:[#allocation7 + $0x1] sm:$0x1] %vm723_vm2, %v740_v13 }
 0x77f   :  { %v724_v18 = vsel %vm723_vm2, %v716_v15, 0.0 }
 0x781   :  { %725 = vadd.xlane.f32.xlu1 %v724_v18 }
 0x782   :  { %954 = shalt.err (!%p951_p12)
}
 0x783   :  { %s955_s28 = scalar_lea.hbm %s1215_s8, 32 }
 0x784   :  { %p956_p13 = scmp.ne.s32.totalorder %s1215_s8, %s955_s28  ;;  %p959_p0 = scmp.lt.u32.totalorder %s955_s28, %s1215_s8 }
 0x786   :  { %p961_p1 = pnand %p959_p0, %p956_p13 }
 0x788   :  { %964 = shalt.err (!%p961_p1)
}
 0x789   :  { %769 = dma.vmem_to_hbm [thread:$0]  %s767_s24, 32, %s1215_s8, [#allocation8]   ;;  %v169_v20 = vpop.xlane.xlu1 %168  ;;  %v85_v17 = vand.u32 127, %v54_v0  ;;  %v323_v21 = vpop.xlane.xlu0 %322  ;;  %vm732_vm10 = vcmask 1040384   ;;  %v746_v47 = vstv %s1213_s6  ;;  %vm748_vm11 = vcmask 58368  }
 0x78a   :  { %s999_s14 = smov [#allocation6]  }
 0x78b   :  { %vm245_vm1 = vcmp.eq.s32.totalorder %v85_v17, 1  ;;  %vm324_vm3 = vcmp.eq.s32.totalorder %v85_v17, 2  ;;  %vm404_vm4 = vcmp.eq.s32.totalorder %v85_v17, 3  ;;  %vm170_vm5 = vcmp.eq.s32.totalorder %v85_v17, 0  ;;  %s756_s15 = sshll.u32 %s999_s14, 4  ;;  %s757_s15 = int_to_ptr.vmem [resolvable:$true] %s756_s15 }
 0x78c   :  { %v325_v23 = vsel %vm324_vm3, %v323_v21, 0.0  ;;  %vm484_vm6 = vcmp.eq.s32.totalorder %v85_v17, 4  ;;  %vm564_vm7 = vcmp.eq.s32.totalorder %v85_v17, 5  ;;  %v171_v27 = vsel %vm170_vm5, %v169_v20, 0.0  ;;  %s965_s16 = scalar_lea.vmem %s757_s15, 32  ;;  %p970_p3 = scmp.lt.s32.totalorder %s757_s15, %s757_s15 }
 0x78d   :  { %v244_v29 = vpop.xlane.xlu1 %243  ;;  %v327_v26 = vrot.slane %v325_v23, 2  ;;  %vm644_vm8 = vcmp.eq.s32.totalorder %v85_v17, 6  ;;  %vm727_vm9 = vcmp.eq.s32.totalorder %v85_v17, 7  ;;  %p966_p2 = scmp.ne.s32.totalorder %s757_s15, %s965_s16  ;;  %p971_p4 = scmp.lt.s32.totalorder %s965_s16, %s965_s16 }
 0x78e   :  { %v246_v22 = vsel %vm245_vm1, %v244_v29, 0.0 }
 0x78f   :  { %v248_v4 = vrot.slane %v246_v22, 1  ;;  %p972_p5 = por %p971_p4, %p970_p3 }
 0x791   :  { %v403_v16 = vpop.xlane.xlu1 %402  ;;  %v250_v6 = vadd.f32 %v248_v4, %v171_v27  ;;  %p973_p6 = pnand %p972_p5, %p966_p2 }
 0x792   :  { %v405_v25 = vsel %vm404_vm4, %v403_v16, 0.0 }
 0x793   :  { %v407_v30 = vrot.slane %v405_v25, 3  ;;  %v329_v31 = vadd.f32 %v327_v26, %v250_v6 }
 0x795   :  { %v483_v19 = vpop.xlane.xlu1 %482  ;;  %v409_v35 = vadd.f32 %v407_v30, %v329_v31 }
 0x796   :  { %v485_v1 = vsel %vm484_vm6, %v483_v19, 0.0 }
 0x797   :  { %v487_v32 = vrot.slane %v485_v1, 4 }
 0x799   :  { %v563_v24 = vpop.xlane.xlu1 %562  ;;  %v489_v37 = vadd.f32 %v487_v32, %v409_v35 }
 0x79a   :  { %v565_v0 = vsel %vm564_vm7, %v563_v24, 0.0 }
 0x79b   :  { %v567_v36 = vrot.slane %v565_v0, 5 }
 0x79d   :  { %v643_v28 = vpop.xlane.xlu1 %642  ;;  %v569_v41 = vadd.f32 %v567_v36, %v489_v37 }
 0x79e   :  { %v645_v33 = vsel %vm644_vm8, %v643_v28, 0.0 }
 0x79f   :  { %v647_v38 = vrot.slane %v645_v33, 6 }
 0x7a1   :  { %v649_v45 = vadd.f32 %v647_v38, %v569_v41 }
 0x80a   :  { %v722_v34 = vpop.xlane.xlu1 %721 }
 0x80b   :  { %v728_v39 = vsel %vm727_vm9, %v722_v34, 0.0 }
 0x80c   :  { %v733_v43 = vrot.slane %v728_v39, 7 }
 0x80e   :  { %v726_v40 = vpop.xlane.xlu1 %725 }
 0x80f   :  { %v729_v42 = vsel %vm727_vm9, %v726_v40, 0.0 }
 0x810   :  { %v734_v44 = vrot.slane %v729_v42, 7 }
 0x812   :  { %v735_v46 = vsel %vm732_vm10, %v733_v43, %v734_v44 }
 0x813   :  { %v737_v48 = vadd.f32 %v735_v46, %v649_v45 }
 0x815   :  { %v747_v49 = vadd.f32 %v746_v47, %v737_v48 }
 0x817   :  { %749 = vst.msk [vmem:[#allocation6] sm:$0x3] %vm748_vm11, %v747_v49 }
 0x818   :  { %976 = shalt.err (!%p973_p6)
}
 0x819   :  { %s977_s3 = scalar_lea.hbm %s1214_s7, 32 }
 0x81a   :  { %p978_p7 = scmp.ne.s32.totalorder %s1214_s7, %s977_s3  ;;  %p981_p8 = scmp.lt.u32.totalorder %s977_s3, %s1214_s7 }
 0x81c   :  { %p983_p9 = pnand %p981_p8, %p978_p7 }
 0x81e   :  { %986 = shalt.err (!%p983_p9)
}
 0x81f   :  { %759 = dma.vmem_to_hbm [thread:$0]  %s757_s15, 32, %s1214_s7, [#allocation5]  }
 0x820   :  { %989 = dma.done.wait [#allocation5], 32  }
 0x821   :  { %990 = vsyncadd [#allocation5], 4294967264 }
 0x822   :  { %991 = dma.done.wait [#allocation8], 32  }
 0x823   :  { %992 = vsyncadd [#allocation8], 4294967264 }
 0x824   :  { %776 = vsyncpa [#allocation4], 1 }
 0x825   :  { %777 = vsyncpa [#allocation5], 1 }
 0x826   :  { %778 = vsyncpa [#allocation8], 1 }

</bundles_post_ra>
